<compile_context>
chip_gen: v5e
topology: v5e:2x2
jax: 0.10.0
libtpu: 0.0.40
codegen_flags: <defaults>
</compile_context>

<pallas_src>
import jax
import jax.numpy as jnp
from jax.experimental import pallas as pl
from jax.experimental.pallas import tpu as pltpu


def _fused_bn_kernel(inp_ref, p_ref, out_ref):
    # inp_ref/out_ref: (TM, TL) data tiles; p_ref: (TM, 8) packed per-row params.
    inp = inp_ref[...]
    p = p_ref[...]
    s1 = p[:, 0:1]
    t1 = p[:, 1:2]
    a = p[:, 2:3]
    b = p[:, 3:4]
    d = p[:, 4:5]
    x = jnp.maximum(inp * s1 + t1, 0.0)          # relu(bn1(inp))
    out_ref[...] = x * a + inp * b + d           # bn2, +inp, bn3, +inp folded


def _round_up(x, m):
    return ((x + m - 1) // m) * m


def _choose_tiles(M, L, dtype_bytes=4, tile_budget_bytes=4 * 1024 * 1024):
    """Pick (TM, TL) so one data tile is ~tile_budget_bytes and (8,128)-legal."""
    LANE, SUB = 128, 8
    # Lane-tiling guard: if even an 8-row slab of full-L rows exceeds the budget
    # (e.g. 1024x1024 spatial), tile the lane dim in multiples of 128.
    if SUB * L * dtype_bytes <= tile_budget_bytes:
        TL = L
    else:
        TL = max(LANE, (tile_budget_bytes // (SUB * dtype_bytes)) // LANE * LANE)
    # Row tiling given TL.
    rows = max(SUB, (tile_budget_bytes // (TL * dtype_bytes)) // SUB * SUB)
    if M <= SUB or rows >= M:
        TM = M  # full rows in one block (legal even when M % 8 != 0)
        # Don't collapse non-trivial problems to grid=(1,): keep >= 2 row tiles
        # so in/out DMA overlaps compute and both v7x TensorCores get work.
        if M >= 2 * SUB and M * L * dtype_bytes > (1 << 20):
            TM = _round_up(pl.cdiv(M, 2), SUB)
    else:
        TM = rows  # multiple of 8; last block may be partial (masked)
    return TM, TL


def fused_forward(inp_nchw, bn1, bn2, bn3, eps=1e-5):
    """inp_nchw: (N, C, H, W) float32.
    bn*: dicts with 'weight', 'bias', 'running_mean', 'running_var' of shape (C,)."""
    N, C, H, W = inp_nchw.shape
    M, L = N * C, H * W

    # Free view: NCHW is already contiguous as (N*C, H*W); no transpose / pad.
    inp2d = inp_nchw.reshape(M, L)

    # Fold BN1/ReLU/BN2/residual/BN3/residual into per-channel scalars.
    def scale_shift(p):
        s = p["weight"] / jnp.sqrt(p["running_var"] + eps)
        t = p["bias"] - p["running_mean"] * s
        return s, t

    s1, t1 = scale_shift(bn1)
    s2, t2 = scale_shift(bn2)
    s3, t3 = scale_shift(bn3)
    a = s2 * s3          # scale on relu(bn1(inp))
    b = s3 + 1.0         # scale on the residual input
    d = t2 * s3 + t3     # constant shift

    # Pack the 5 per-channel scalars into one (M, 8) array (pad cols 5..7).
    zero = jnp.zeros_like(s1)
    params_c = jnp.stack([s1, t1, a, b, d, zero, zero, zero], axis=1)  # (C, 8)
    params = jnp.tile(params_c, (N, 1)).astype(jnp.float32)            # (M, 8)

    TM, TL = _choose_tiles(M, L)
    grid = (pl.cdiv(M, TM), pl.cdiv(L, TL))

    data_spec = pl.BlockSpec((TM, TL), lambda i, j: (i, j))
    prm_spec = pl.BlockSpec((TM, 8), lambda i, j: (i, 0))

    cost = pl.CostEstimate(
        flops=7 * M * L,
        transcendentals=0,
        bytes_accessed=(2 * M * L + 8 * M) * 4,
    )

    out2d = pl.pallas_call(
        _fused_bn_kernel,
        out_shape=jax.ShapeDtypeStruct((M, L), jnp.float32),
        grid_spec=pltpu.PrefetchScalarGridSpec(
            num_scalar_prefetch=0,
            grid=grid,
            in_specs=[data_spec, prm_spec],
            out_specs=data_spec,
        ),
        compiler_params=pltpu.CompilerParams(
            dimension_semantics=("parallel", "parallel"),
            vmem_limit_bytes=48 * 1024 * 1024,
        ),
        cost_estimate=cost,
    )(inp2d, params)

    return out2d.reshape(N, C, H, W)   # free view back to NCHW


def reference_forward(inp, bn1, bn2, bn3, eps=1e-5):
    # Pure-JAX reference (inference-mode BN) matching the PyTorch module in eval().
    def bn(v, p):
        s = p["weight"] / jnp.sqrt(p["running_var"] + eps)
        t = p["bias"] - p["running_mean"] * s
        return v * s[None, :, None, None] + t[None, :, None, None]

    x = bn(inp, bn1)
    x = jnp.maximum(x, 0.0)
    x = bn(x, bn2)
    x = x + inp
    x = bn(x, bn3)
    return x + inp


if __name__ == "__main__":
    key = jax.random.PRNGKey(0)
    k_inp, k1, k2, k3 = jax.random.split(key, 4)

    N, C, H, W = 2, 3, 16, 16   # BatchNorm2d(3) in the module -> C = 3
    inp = jax.random.normal(k_inp, (N, C, H, W), jnp.float32)

    def make_bn_params(k):
        kw, kb, kv, km = jax.random.split(k, 4)
        return {
            "weight": jax.random.uniform(kw, (C,), jnp.float32),
            "bias": jax.random.uniform(kb, (C,), jnp.float32),
            "running_var": jnp.abs(jax.random.uniform(kv, (C,), jnp.float32)),
            "running_mean": jax.random.uniform(km, (C,), jnp.float32),
        }

    bn1_p = make_bn_params(k1)
    bn2_p = make_bn_params(k2)
    bn3_p = make_bn_params(k3)

    out = fused_forward(inp, bn1_p, bn2_p, bn3_p)
    out = jax.block_until_ready(out)

    ref = reference_forward(inp, bn1_p, bn2_p, bn3_p)
    assert out.shape == (N, C, H, W)
    assert jnp.allclose(out, ref, atol=1e-4, rtol=1e-4), "mismatch vs reference"

    print("KERNEL_OK")
</pallas_src>

<mosaic_0001>
module attributes {stable_mosaic.version = 11 : i64} {
  func.func @_fused_bn_kernel(%arg0: i32, %arg1: i32, %arg2: memref<6x256xf32, #tpu.memory_space<vmem>>, %arg3: memref<6x8xf32, #tpu.memory_space<vmem>>, %arg4: memref<6x256xf32, #tpu.memory_space<vmem>>) attributes {dimension_semantics = [#tpu.dimension_semantics<parallel>, #tpu.dimension_semantics<parallel>], iteration_bounds = array<i64: 1, 1>, scalar_prefetch = 0 : i64, scratch_operands = 0 : i64, tpu.core_type = #tpu.core_type<tc>, window_params = [{transform_indices = @transform_0, window_bounds = array<i64: 6, 256>}, {transform_indices = @transform_1, window_bounds = array<i64: 6, 8>}, {transform_indices = @transform_2, window_bounds = array<i64: 6, 256>}]} {
    %c0 = arith.constant 0 : index
    %c0_0 = arith.constant 0 : index
    %0 = vector.load %arg2[%c0, %c0_0] : memref<6x256xf32, #tpu.memory_space<vmem>>, vector<6x256xf32>
    %c0_1 = arith.constant 0 : index
    %c0_2 = arith.constant 0 : index
    %1 = vector.load %arg3[%c0_1, %c0_2] : memref<6x8xf32, #tpu.memory_space<vmem>>, vector<6x8xf32>
    %2 = vector.extract_strided_slice %1 {offsets = [0, 0], sizes = [6, 1], strides = [1, 1]} : vector<6x8xf32> to vector<6x1xf32>
    %3 = vector.extract_strided_slice %1 {offsets = [0, 1], sizes = [6, 1], strides = [1, 1]} : vector<6x8xf32> to vector<6x1xf32>
    %4 = vector.extract_strided_slice %1 {offsets = [0, 2], sizes = [6, 1], strides = [1, 1]} : vector<6x8xf32> to vector<6x1xf32>
    %5 = vector.extract_strided_slice %1 {offsets = [0, 3], sizes = [6, 1], strides = [1, 1]} : vector<6x8xf32> to vector<6x1xf32>
    %6 = vector.extract_strided_slice %1 {offsets = [0, 4], sizes = [6, 1], strides = [1, 1]} : vector<6x8xf32> to vector<6x1xf32>
    %7 = vector.broadcast %2 : vector<6x1xf32> to vector<6x256xf32>
    %8 = arith.mulf %0, %7 : vector<6x256xf32>
    %9 = vector.broadcast %3 : vector<6x1xf32> to vector<6x256xf32>
    %10 = arith.addf %8, %9 : vector<6x256xf32>
    %cst = arith.constant 0.000000e+00 : f32
    %11 = vector.broadcast %cst : f32 to vector<6x256xf32>
    %12 = arith.maximumf %10, %11 : vector<6x256xf32>
    %13 = vector.broadcast %4 : vector<6x1xf32> to vector<6x256xf32>
    %14 = arith.mulf %12, %13 : vector<6x256xf32>
    %15 = vector.broadcast %5 : vector<6x1xf32> to vector<6x256xf32>
    %16 = arith.mulf %0, %15 : vector<6x256xf32>
    %17 = arith.addf %14, %16 : vector<6x256xf32>
    %18 = vector.broadcast %6 : vector<6x1xf32> to vector<6x256xf32>
    %19 = arith.addf %17, %18 : vector<6x256xf32>
    %c0_3 = arith.constant 0 : index
    %c0_4 = arith.constant 0 : index
    %20 = vector.load %arg4[%c0_3, %c0_4] : memref<6x256xf32, #tpu.memory_space<vmem>>, vector<6x256xf32>
    tpu.vector_store %arg4[%c0_3, %c0_4], %19 {strides = array<i32>} : memref<6x256xf32, #tpu.memory_space<vmem>>, vector<6x256xf32>,
    return
  }
  func.func @transform_0(%arg0: i32, %arg1: i32) -> (i32, i32) {
    %c0_i32 = arith.constant 0 : i32
    return %arg0, %arg1 : i32, i32
  }
  func.func @transform_1(%arg0: i32, %arg1: i32) -> (i32, i32) {
    %c0_i32 = arith.constant 0 : i32
    %c0_i32_0 = arith.constant 0 : i32
    return %arg0, %c0_i32 : i32, i32
  }
  func.func @transform_2(%arg0: i32, %arg1: i32) -> (i32, i32) {
    %c0_i32 = arith.constant 0 : i32
    return %arg0, %arg1 : i32, i32
  }
}

</mosaic_0001>

<bundles_post_ra>
// kernel: tpu_custom_call.1
= control target key start
LH: loop header
LB: loop body
LE: loop exit
PB: predicated region body
PF: predicated region fallthrough
CT: control target
= control target key end

     0   :  { %7 = vsyncpa [#allocation3], 0  ;;  %s222_s0 = inlined_call_operand.hbm [shape: f32[6,256], index: 0, kind: input, shape index: {}]   ;;  %s223_s1 = inlined_call_operand.hbm [shape: f32[6,8], index: 1, kind: input, shape index: {}]   ;;  %s224_s2 = inlined_call_operand.hbm [shape: f32[6,256], index: 2, kind: output, shape index: {}]  }
   0x1   :  { %8 = vsyncpa [#allocation6], 0 }
   0x2   :  { %9 = vsyncpa [#allocation4], 0  ;;  %s15_s11 = sshll.u32 %s222_s0, 4  ;;  %s190_s12 = smov [#allocation2]   ;;  %s16_s11 = int_to_ptr.hbm [resolvable:$true] %s15_s11 }
   0x3   :  { %s17_s13 = sshll.u32 %s190_s12, 4  ;;  %s26_s16 = sshll.u32 %s223_s1, 4  ;;  %s18_s13 = int_to_ptr.vmem [resolvable:$true] %s17_s13  ;;  %s27_s16 = int_to_ptr.hbm [resolvable:$true] %s26_s16 }
   0x4   :  { %20 = dma.hbm_to_vmem [thread:$0]  %s16_s11, 256, %s18_s13, [#allocation3]  }
   0x5   :  { %s191_s17 = smov [#allocation5]  }
   0x6   :  { %s28_s18 = sshll.u32 %s191_s17, 4  ;;  %s29_s18 = int_to_ptr.vmem [resolvable:$true] %s28_s18 }
   0x7   :  { %31 = dma.hbm_to_vmem [thread:$0]  %s27_s16, 128, %s29_s18, [#allocation6]  }
   0x8   :  { %184 = dma.done.wait [#allocation3], 256  }
   0x9   :  { %185 = vsyncadd [#allocation3], 4294967040 }
   0xa   :  { %186 = dma.done.wait [#allocation6], 128  }
   0xb   :  { %187 = vsyncadd [#allocation6], 4294967168  ;;  %v192_v0 = vmov 0   ;;  %v193_v1 = vmov 2   ;;  %v194_v2 = vmov 4   ;;  %v195_v4 = vmov 1  }
   0xc   :  { %106 = vset.pattern.permute.xlu0 %v192_v0  ;;  %108 = vset.pattern.permute.xlu1 %v193_v1  ;;  %v42_v3 = vld [vmem:[#allocation5] sm:$0x3f]  ;;  %v196_v5 = vmov 3   ;;  %v40_v8 = vld [vmem:[#allocation2] sm:$0x3f]  ;;  %s197_s0 = smov [#allocation7]  }
   0xd   :  { %110 = vset.pattern.permute.xlu2 %v194_v2  ;;  %45 = vperm.xlu0 %106, %v42_v3   ;;  %v41_v9 = vld [vmem:[#allocation2 + $0x8] sm:$0x3f]  ;;  %s85_s1 = sshll.u32 %s197_s0, 4  ;;  %s87_s21 = sshll.u32 %s224_s2, 4  ;;  %s86_s1 = int_to_ptr.vmem [resolvable:$true] %s85_s1  ;;  %s88_s21 = int_to_ptr.hbm [resolvable:$true] %s87_s21 }
   0xe   :  { %59 = vperm.xlu1 %108, %v42_v3   ;;  %73 = vperm.xlu2 %110, %v42_v3  }
  0x15   :  { %107 = vset.pattern.permute.xlu0 %v195_v4 }
  0x16   :  { %109 = vset.pattern.permute.xlu1 %v196_v5  ;;  %51 = vperm.xlu0 %107, %v42_v3  }
  0x17   :  { %65 = vperm.xlu1 %109, %v42_v3  }
  0x1e   :  { %111 = vset.pattern.permute.xlu0 %v194_v2 }
  0x68   :  { %v74_v22 = vpop.permute.xlu2 %73 }
  0x7f   :  { %v46_v6 = vpop.permute.xlu0 %45 }
  0x80   :  { %v60_v7 = vpop.permute.xlu1 %59  ;;  %v48_v10 = vmul.f32 %v46_v6, %v40_v8  ;;  %v49_v11 = vmul.f32 %v46_v6, %v41_v9 }
  0x88   :  { %v52_v12 = vpop.permute.xlu0 %51 }
  0x89   :  { %v66_v13 = vpop.permute.xlu1 %65  ;;  %v54_v14 = vadd.f32 %v52_v12, %v48_v10  ;;  %v55_v15 = vadd.f32 %v52_v12, %v49_v11 }
  0x8a   :  { %v68_v18 = vmul.f32 %v66_v13, %v40_v8  ;;  %v69_v19 = vmul.f32 %v66_v13, %v41_v9 }
  0x8b   :  { %v56_v16 = vmax.f32 %v54_v14, 0.0  ;;  %v57_v17 = vmax.f32 %v55_v15, 0.0 }
  0x8d   :  { %v62_v20 = vmul.f32 %v60_v7, %v56_v16  ;;  %v63_v21 = vmul.f32 %v60_v7, %v57_v17 }
  0x8f   :  { %v70_v23 = vadd.f32 %v68_v18, %v62_v20  ;;  %v71_v24 = vadd.f32 %v69_v19, %v63_v21 }
  0x91   :  { %v76_v25 = vadd.f32 %v74_v22, %v70_v23  ;;  %v77_v26 = vadd.f32 %v74_v22, %v71_v24 }
  0x93   :  { %78 = vst [vmem:[#allocation7] sm:$0x3f] %v76_v25 }
  0x94   :  { %79 = vst [vmem:[#allocation7 + $0x8] sm:$0x3f] %v77_v26 }
  0x95   :  { %90 = dma.vmem_to_hbm [thread:$0]  %s86_s1, 256, %s88_s21, [#allocation4]  }
  0x96   :  { %188 = dma.done.wait [#allocation4], 256  }
  0x97   :  { %189 = vsyncadd [#allocation4], 4294967040 }
  0x98   :  { %95 = vsyncpa [#allocation3], 1 }
  0x99   :  { %96 = vsyncpa [#allocation6], 1 }
  0x9a   :  { %97 = vsyncpa [#allocation4], 1 }

</bundles_post_ra>
